<compile_context>
chip_gen: v6e
topology: v6e:2x2x1
jax: 0.10.0
libtpu: 0.0.40
codegen_flags: <defaults>
</compile_context>

<pallas_src>
import jax
import jax.numpy as jnp
from jax.experimental import pallas as pl
from jax.experimental.pallas import tpu as pltpu


def _round_up(v, m):
    return (v + m - 1) // m * m


def _normed_linear_kernel(x_ref, w_ref, inv_wn_ref, o_ref):
    # x_ref:      (TM, K)  row tile of the input (double-buffered)
    # w_ref:      (K, Mp)  full weight, VMEM-resident across row tiles
    # inv_wn_ref: (1, Mp)  precomputed 1 / max(||w_col||, 1e-12)
    # o_ref:      (TM, Mp) output tile
    x = x_ref[...]
    w = w_ref[...]

    # Row L2 norm math in f32; matmul consumes the raw-dtype operands.
    xf = x.astype(jnp.float32)
    row_sq = jnp.sum(xf * xf, axis=1, keepdims=True)            # (TM, 1)
    # rsqrt(max(sum_sq, 1e-24)) == 1 / max(||x_row||, 1e-12)  (EUP, ~free)
    inv_xn = jax.lax.rsqrt(jnp.maximum(row_sq, 1e-24))          # (TM, 1)

    # Deferred normalization: scale the (TM, Mp) MXU result instead of the
    # (TM, K) and (K, Mp) operands.
    acc = jnp.dot(x, w, preferred_element_type=jnp.float32)     # (TM, Mp)
    o_ref[...] = (acc * inv_xn * inv_wn_ref[...]).astype(o_ref.dtype)


def normed_linear(x, weight, *, block_rows=256):
    """out = F.normalize(x, dim=1) @ F.normalize(weight, dim=0)."""
    n, k = x.shape
    k_w, m = weight.shape
    assert k == k_w

    # Hoist the weight column-norm reciprocal out of the per-tile path
    # (one-time setup in the wrapper).
    w32 = weight.astype(jnp.float32)
    col_sq = jnp.sum(w32 * w32, axis=0, keepdims=True)          # (1, M)
    inv_wn = jax.lax.rsqrt(jnp.maximum(col_sq, 1e-24))          # (1, M)

    # Lane-dense output: pad out_features up to a multiple of 128.
    m_pad = _round_up(max(m, 128), 128)
    # Row tile: multiple of 8 (sublane), capped at block_rows.
    tm = min(_round_up(block_rows, 8), _round_up(n, 8))
    n_pad = _round_up(n, tm)

    x_p = jnp.pad(x, ((0, n_pad - n), (0, 0)))
    w_p = jnp.pad(weight, ((0, 0), (0, m_pad - m)))
    inv_wn_p = jnp.pad(inv_wn, ((0, 0), (0, m_pad - m)))

    out = pl.pallas_call(
        _normed_linear_kernel,
        out_shape=jax.ShapeDtypeStruct((n_pad, m_pad), x.dtype),
        grid_spec=pltpu.PrefetchScalarGridSpec(
            num_scalar_prefetch=0,
            grid=(n_pad // tm,),
            in_specs=[
                # x: tiled over rows -> pipelined (DMA i+1 overlaps compute i)
                pl.BlockSpec((tm, k), lambda i: (i, 0)),
                # weight: same block every step -> stays VMEM-resident
                pl.BlockSpec((k, m_pad), lambda i: (0, 0)),
                # reciprocal column norms: resident
                pl.BlockSpec((1, m_pad), lambda i: (0, 0)),
            ],
            out_specs=pl.BlockSpec((tm, m_pad), lambda i: (i, 0)),
        ),
        compiler_params=pltpu.CompilerParams(
            # Independent row tiles -> shard across both v7x TensorCores.
            dimension_semantics=("parallel",),
        ),
    )(x_p, w_p, inv_wn_p)

    return out[:n, :m]


def init_normed_linear_weight(key, in_features, out_features):
    """Deterministic replication of:
         torch.Tensor(in, out).uniform_(-1, 1).renorm_(2, 1, 1e-5).mul_(1e5)
    renorm_(2, 1, maxnorm): each column (slice along dim=1, shape
    (in_features,)) is rescaled so its L2 norm is at most maxnorm; PyTorch
    uses scale = maxnorm / (norm + 1e-7) when norm > maxnorm.
    """
    w = jax.random.uniform(
        key, (in_features, out_features), jnp.float32, minval=-1.0, maxval=1.0
    )
    col_norm = jnp.sqrt(jnp.sum(w * w, axis=0, keepdims=True))
    maxnorm = 1e-5
    scale = jnp.where(col_norm > maxnorm, maxnorm / (col_norm + 1e-7), 1.0)
    w = w * scale
    w = w * 100000.0
    return w


if __name__ == "__main__":
    key = jax.random.PRNGKey(0)
    k_x, k_w = jax.random.split(key)

    batch = 8
    in_features = 32
    out_features = 16

    x = jax.random.normal(k_x, (batch, in_features), jnp.float32)
    weight = init_normed_linear_weight(k_w, in_features, out_features)

    out = jax.block_until_ready(normed_linear(x, weight))

    # Pure-JAX reference (same semantics as the PyTorch forward).
    x_ref = x / jnp.maximum(jnp.linalg.norm(x, axis=1, keepdims=True), 1e-12)
    w_ref = weight / jnp.maximum(
        jnp.linalg.norm(weight, axis=0, keepdims=True), 1e-12
    )
    ref = x_ref @ w_ref

    assert out.shape == (batch, out_features)
    assert jnp.allclose(out, ref, atol=1e-5, rtol=1e-5)

    print("KERNEL_OK")
</pallas_src>

<mosaic_0001>
module attributes {stable_mosaic.version = 11 : i64} {
  func.func @_normed_linear_kernel(%arg0: i32, %arg1: memref<8x32xf32, #tpu.memory_space<vmem>>, %arg2: memref<32x128xf32, #tpu.memory_space<vmem>>, %arg3: memref<1x128xf32, #tpu.memory_space<vmem>>, %arg4: memref<8x128xf32, #tpu.memory_space<vmem>>) attributes {dimension_semantics = [#tpu.dimension_semantics<parallel>], iteration_bounds = array<i64: 1>, scalar_prefetch = 0 : i64, scratch_operands = 0 : i64, tpu.core_type = #tpu.core_type<tc>, window_params = [{transform_indices = @transform_0, window_bounds = array<i64: 8, 32>}, {pipeline_mode = #tpu.pipeline_mode<synchronous>, transform_indices = @transform_1, window_bounds = array<i64: 32, 128>}, {pipeline_mode = #tpu.pipeline_mode<synchronous>, transform_indices = @transform_2, window_bounds = array<i64: 1, 128>}, {transform_indices = @transform_3, window_bounds = array<i64: 8, 128>}]} {
    %c0 = arith.constant 0 : index
    %c0_0 = arith.constant 0 : index
    %0 = vector.load %arg1[%c0, %c0_0] : memref<8x32xf32, #tpu.memory_space<vmem>>, vector<8x32xf32>
    %c0_1 = arith.constant 0 : index
    %c0_2 = arith.constant 0 : index
    %1 = vector.load %arg2[%c0_1, %c0_2] : memref<32x128xf32, #tpu.memory_space<vmem>>, vector<32x128xf32>
    %2 = arith.mulf %0, %0 : vector<8x32xf32>
    %cst = arith.constant dense<0.000000e+00> : vector<8xf32>
    %3 = vector.multi_reduction <add>, %2, %cst [1] : vector<8x32xf32> to vector<8xf32>
    %4 = vector.shape_cast %3 : vector<8xf32> to vector<8x1xf32>
    %cst_3 = arith.constant 1.000000e-24 : f32
    %5 = vector.broadcast %cst_3 : f32 to vector<8x1xf32>
    %6 = arith.maximumf %4, %5 : vector<8x1xf32>
    %7 = math.rsqrt %6 : vector<8x1xf32>
    %cst_4 = arith.constant dense<0.000000e+00> : vector<8x128xf32>
    %8 = tpu.matmul %0, %1, %cst_4 {dimension_numbers = #tpu.dot_dimension_numbers<[1], [0], [0], [1], [0, 0, 1, 1], [], []>} : vector<8x32xf32>, vector<32x128xf32>, vector<8x128xf32> -> vector<8x128xf32>
    %9 = vector.broadcast %7 : vector<8x1xf32> to vector<8x128xf32>
    %10 = arith.mulf %8, %9 : vector<8x128xf32>
    %c0_5 = arith.constant 0 : index
    %c0_6 = arith.constant 0 : index
    %11 = vector.load %arg3[%c0_5, %c0_6] : memref<1x128xf32, #tpu.memory_space<vmem>>, vector<1x128xf32>
    %12 = vector.broadcast %11 : vector<1x128xf32> to vector<8x128xf32>
    %13 = arith.mulf %10, %12 : vector<8x128xf32>
    %c0_7 = arith.constant 0 : index
    %c0_8 = arith.constant 0 : index
    %14 = vector.load %arg4[%c0_7, %c0_8] : memref<8x128xf32, #tpu.memory_space<vmem>>, vector<8x128xf32>
    tpu.vector_store %arg4[%c0_7, %c0_8], %13 {strides = array<i32>} : memref<8x128xf32, #tpu.memory_space<vmem>>, vector<8x128xf32>,
    return
  }
  func.func @transform_0(%arg0: i32) -> (i32, i32) {
    %c0_i32 = arith.constant 0 : i32
    %c0_i32_0 = arith.constant 0 : i32
    return %arg0, %c0_i32 : i32, i32
  }
  func.func @transform_1(%arg0: i32) -> (i32, i32) {
    %c0_i32 = arith.constant 0 : i32
    %c0_i32_0 = arith.constant 0 : i32
    %c0_i32_1 = arith.constant 0 : i32
    return %c0_i32, %c0_i32_0 : i32, i32
  }
  func.func @transform_2(%arg0: i32) -> (i32, i32) {
    %c0_i32 = arith.constant 0 : i32
    %c0_i32_0 = arith.constant 0 : i32
    %c0_i32_1 = arith.constant 0 : i32
    return %c0_i32, %c0_i32_0 : i32, i32
  }
  func.func @transform_3(%arg0: i32) -> (i32, i32) {
    %c0_i32 = arith.constant 0 : i32
    %c0_i32_0 = arith.constant 0 : i32
    return %arg0, %c0_i32 : i32, i32
  }
}

</mosaic_0001>

<bundles_post_ra>
// kernel: tpu_custom_call.1
= control target key start
LH: loop header
LB: loop body
LE: loop exit
PB: predicated region body
PF: predicated region fallthrough
CT: control target
= control target key end

     0   :  { %8 = vsyncpa [#allocation3], 0  ;;  %s284_s0 = inlined_call_operand.hbm [shape: f32[8,32], index: 0, kind: input, shape index: {}]   ;;  %s285_s1 = inlined_call_operand.hbm [shape: f32[32,128], index: 1, kind: input, shape index: {}]   ;;  %s286_s2 = inlined_call_operand.vmem [shape: f32[1,128], index: 2, kind: input, shape index: {}]   ;;  %s287_s3 = inlined_call_operand.hbm [shape: f32[8,128], index: 3, kind: output, shape index: {}]  }
   0x1   :  { %9 = vsyncpa [#allocation6], 0 }
   0x2   :  { %10 = vsyncpa [#allocation4], 0  ;;  %s245_s12 = smov [#allocation2]   ;;  %s246_s14 = smov [#allocation5]  }
   0x3   :  { %s17_s13 = sshll.u32 %s245_s12, 4  ;;  %s26_s15 = sshll.u32 %s246_s14, 4  ;;  %s18_s13 = int_to_ptr.vmem [resolvable:$true] %s17_s13  ;;  %s27_s15 = int_to_ptr.vmem [resolvable:$true] %s26_s15 }
   0x4   :  { %s187_s16 = scalar_lea.vmem %s18_s13, 128  ;;  %p192_p1 = scmp.lt.s32.totalorder %s18_s13, %s18_s13 }
   0x5   :  { %p188_p0 = scmp.ne.s32.totalorder %s18_s13, %s187_s16  ;;  %p193_p2 = scmp.lt.s32.totalorder %s187_s16, %s187_s16 }
   0x7   :  { %p194_p3 = por %p193_p2, %p192_p1 }
   0x9   :  { %p195_p4 = pnand %p194_p3, %p188_p0 }
   0xb   :  { %198 = shalt.err (!%p195_p4)
}
   0xc   :  { %20 = dma.hbm_to_vmem [thread:$0]  %s284_s0, 128, %s18_s13, [#allocation3]  }
   0xd   :  { %s207_s19 = scalar_lea.vmem %s27_s15, 512  ;;  %p212_p6 = scmp.lt.s32.totalorder %s27_s15, %s27_s15 }
   0xe   :  { %p208_p5 = scmp.ne.s32.totalorder %s27_s15, %s207_s19  ;;  %p213_p7 = scmp.lt.s32.totalorder %s207_s19, %s207_s19 }
  0x10   :  { %p214_p8 = por %p213_p7, %p212_p6 }
  0x12   :  { %p215_p9 = pnand %p214_p8, %p208_p5 }
  0x14   :  { %218 = shalt.err (!%p215_p9)
}
  0x15   :  { %s247_s20 = smov 128   ;;  %s248_s21 = smov 8  }
  0x16   :  { %32 = dma.hbm_to_vmem [thread:$0]  %s285_s1, 512, %s27_s15, [#allocation6], %s247_s20, %s247_s20, %s248_s21  }
  0x17   :  { %239 = dma.done.wait [#allocation3], 128  }
  0x18   :  { %240 = vsyncadd [#allocation3], 4294967168 }
  0x19   :  { %241 = dma.done.wait [#allocation6], 512  }
  0x1a   :  { %242 = vsyncadd [#allocation6], 4294966784  ;;  %v249_v0 = vmov 0.0   ;;  %vm250_vm0 = vmmov 0   ;;  %v45_v1 = vld [vmem:[#allocation5 + $0x18] sm:$0xff]  ;;  %v44_v2 = vld [vmem:[#allocation5 + $0x10] sm:$0xff] }
  0x1b   :  { %159 = vmatprep.subr.mxu0 %v249_v0  ;;  %167 = vmatprep.mubr.msk.f32.mxu0 %vm250_vm0, %v249_v0  ;;  %v41_v3 = vld [vmem:[#allocation2] sm:$0xff]  ;;  %v43_v4 = vld [vmem:[#allocation5 + $0x8] sm:$0xff]  ;;  %vm47_vm1 = vcmask 261120   ;;  %v42_v6 = vld [vmem:[#allocation5] sm:$0xff]  ;;  %s251_s24 = smov [#allocation7]  }
  0x1c   :  { %160 = vmatpush3.msra.mxu0 %v45_v1  ;;  %v46_v5 = vmul.f32 %v41_v3, %v41_v3  ;;  %v153_v12 = vld [vmem:[%s286_s2] ss:$0 sm:$0xff]  ;;  %s142_s25 = sshll.u32 %s251_s24, 4  ;;  %s143_s25 = int_to_ptr.vmem [resolvable:$true] %s142_s25 }
  0x1d   :  { %161 = vmatprep.subr.mxu0 %v249_v0  ;;  %s219_s26 = scalar_lea.vmem %s143_s25, 128  ;;  %p224_p11 = scmp.lt.s32.totalorder %s143_s25, %s143_s25 }
  0x1e   :  { %162 = vmatpush3.msra.mxu0 %v44_v2  ;;  %v48_v7 = vsel %vm47_vm1, %v46_v5, 0.0  ;;  %p220_p10 = scmp.ne.s32.totalorder %s143_s25, %s219_s26  ;;  %p225_p12 = scmp.lt.s32.totalorder %s219_s26, %s219_s26 }
  0x1f   :  { %163 = vmatprep.subr.mxu0 %v249_v0  ;;  %49 = vadd.xlane.f32.xlu0 %v48_v7 }
  0x20   :  { %164 = vmatpush3.msra.mxu0 %v43_v4  ;;  %p226_p13 = por %p225_p12, %p224_p11 }
  0x21   :  { %165 = vmatprep.subr.mxu0 %v249_v0 }
  0x22   :  { %166 = vmatpush3.msra.mxu0 %v42_v6  ;;  %p227_p0 = pnand %p226_p13, %p220_p10 }
  0x23   :  { %168 = vmatmul.mubr.msk.f32.vlgmr.msra.gmra.mxu0 %vm47_vm1, %v41_v3 }
  0xa8   :  { %v50_v8 = vpop.xlane.xlu0 %49 }
  0xa9   :  { %v51_v9 = vmax.f32 %v50_v8, 1e-24 }
  0xab   :  { %177 = vrsqrt.f32 %v51_v9 }
  0xb8   :  { %v178_v10 = vpop.eup %177 }
  0xe3   :  { %v122_v11 = vpop.f32.mrf.mxu0 }
  0xe4   :  { %v126_v13 = vmul.f32 %v178_v10, %v122_v11 }
  0xe5   :  { %v169_v14 = vpop.f32.mrf.mxu0 }
  0xe6   :  { %v134_v15 = vmul.f32 %v153_v12, %v126_v13 }
  0xe8   :  { %135 = vst [vmem:[#allocation7] sm:$0xff] %v134_v15 }
  0xe9   :  { %230 = shalt.err (!%p227_p0)
}
  0xea   :  { %145 = dma.vmem_to_hbm [thread:$0]  %s143_s25, 128, %s287_s3, [#allocation4]  }
  0xeb   :  { %243 = dma.done.wait [#allocation4], 128  }
  0xec   :  { %244 = vsyncadd [#allocation4], 4294967168 }
  0xed   :  { %149 = vsyncpa [#allocation3], 1 }
  0xee   :  { %150 = vsyncpa [#allocation6], 1 }
  0xef   :  { %151 = vsyncpa [#allocation4], 1 }

</bundles_post_ra>
